<compile_context>
chip_gen: v7x
topology: tpu7x:2x2x1
jax: 0.10.0
libtpu: 0.0.40
codegen_flags: <defaults>
</compile_context>

<pallas_src>
import functools

import jax
import jax.numpy as jnp
from jax import lax
from jax.experimental import pallas as pl
from jax.experimental.pallas import tpu as pltpu

_MIB = 1024 * 1024


# ----------------------------------------------------------------------------
# helpers
# ----------------------------------------------------------------------------
def _vmem_budget_bytes():
    """Generation-aware scoped-VMEM ceiling (v5e/v6e ~96 MiB, v7x ~48 MiB)."""
    try:
        physical = int(pltpu.get_tpu_info().vmem_capacity_bytes)
    except Exception:
        physical = 64 * _MIB  # conservative fallback (v7x-sized VMEM)
    return min(int(0.75 * physical), 100 * _MIB)


def _compiler_params(semantics, est_bytes):
    # 2x headroom over the (scratch-inclusive) estimate, no blanket 32 MiB
    # floor, capped by the per-generation budget.
    budget = _vmem_budget_bytes()
    limit = int(min(max(2 * est_bytes, 8 * _MIB), budget))
    return pltpu.CompilerParams(dimension_semantics=semantics,
                                vmem_limit_bytes=limit)


def _pick_tile(dim, candidates):
    """Largest candidate tile that evenly divides `dim`, else the full dim."""
    for c in candidates:
        if dim >= c and dim % c == 0:
            return c
    return dim


# ----------------------------------------------------------------------------
# Linear: y = x @ W_t + b, with W_t already in (Din, Dout) layout.
# Grid (M/tm, Dout/tn, Din/tk); the K axis is an "arbitrary" reduction with an
# f32 accumulator in VMEM scratch; bias added on the last K step.
# ----------------------------------------------------------------------------
def _linear_kernel(x_ref, w_ref, b_ref, o_ref, acc_ref):
    k = pl.program_id(2)

    @pl.when(k == 0)
    def _():
        acc_ref[...] = jnp.zeros_like(acc_ref)

    # canonical (m,k) x (k,n): no in-kernel weight transpose on the MXU path.
    acc_ref[...] += jnp.dot(x_ref[...], w_ref[...],
                            preferred_element_type=jnp.float32)

    @pl.when(k == pl.num_programs(2) - 1)
    def _():
        o_ref[...] = (acc_ref[...]
                      + b_ref[...].astype(jnp.float32)).astype(o_ref.dtype)


def linear_pallas(x, w_t, b):
    """x: (..., Din), w_t: (Din, Dout), b: (Dout,) -> (..., Dout)."""
    *lead, din = x.shape
    dout = w_t.shape[1]
    x2 = x.reshape(-1, din)
    m = x2.shape[0]
    b2 = jnp.asarray(b).reshape(1, dout)

    isz = jnp.dtype(x.dtype).itemsize
    budget = _vmem_budget_bytes()

    tm = _pick_tile(m, (1024, 512, 256, 128, 64, 32, 16, 8))
    tn = _pick_tile(dout, (512, 256, 128))
    tk = _pick_tile(din, (512, 256, 128))

    def est(tm_, tn_, tk_):
        return (2 * (tm_ * tk_ + tk_ * tn_ + tn_) * isz   # double-buffered inputs
                + 2 * tm_ * tn_ * isz                     # double-buffered output
                + tm_ * tn_ * 4)                          # f32 accumulator

    # Guard: a full-dim fallback tile could overshoot VMEM; shrink tm if so.
    while est(tm, tn, tk) > budget and tm % 2 == 0 and tm > 8 and m % (tm // 2) == 0:
        tm //= 2

    grid = (m // tm, dout // tn, din // tk)

    cost = pl.CostEstimate(
        flops=2 * m * dout * din,
        transcendentals=0,
        bytes_accessed=(m * din + din * dout + m * dout + dout) * isz)

    out = pl.pallas_call(
        _linear_kernel,
        out_shape=jax.ShapeDtypeStruct((m, dout), x.dtype),
        grid=grid,
        in_specs=[
            pl.BlockSpec((tm, tk), lambda i, j, k: (i, k)),
            pl.BlockSpec((tk, tn), lambda i, j, k: (k, j)),   # (Din, Dout) layout
            pl.BlockSpec((1, tn), lambda i, j, k: (0, j)),
        ],
        out_specs=pl.BlockSpec((tm, tn), lambda i, j, k: (i, j)),
        scratch_shapes=[pltpu.VMEM((tm, tn), jnp.float32)],
        compiler_params=_compiler_params(("parallel", "parallel", "arbitrary"),
                                         est(tm, tn, tk)),
        cost_estimate=cost,
    )(x2, w_t, b2)
    return out.reshape(*lead, dout)


# ----------------------------------------------------------------------------
# Attention: grid (batch, Sq tiles); q is (B, Sq, E), kv is (B, Sk, 2E) holding
# [K | V] along the last axis (output of the fused K/V projection).
# Per-head results go straight into a (tq, E) f32 scratch slab, then one
# lane-dense (tq, E) store.
# ----------------------------------------------------------------------------
def _attn_kernel(q_ref, kv_ref, o_ref, o_acc, *, num_heads, head_dim, scale):
    embed = num_heads * head_dim
    for h in range(num_heads):
        lo = h * head_dim
        hi = lo + head_dim
        # Per-head slices loaded straight off the refs; scale only the (tq, Dh)
        # slice (no full-width scaled-q temporary kept live across the loop).
        qh = q_ref[:, lo:hi] * scale                              # (tq, Dh)
        kh = kv_ref[:, lo:hi]                                     # (Sk, Dh)
        vh = kv_ref[:, embed + lo:embed + hi]                     # (Sk, Dh)
        # scores: contract head_dim of q and k directly (no k.T materialized)
        s = lax.dot_general(qh, kh,
                            dimension_numbers=(((1,), (1,)), ((), ())),
                            preferred_element_type=jnp.float32)   # (tq, Sk)
        mx = jnp.max(s, axis=-1, keepdims=True)
        p = jnp.exp(s - mx)
        denom = jnp.sum(p, axis=-1, keepdims=True)
        pv = jnp.dot(p.astype(vh.dtype), vh,
                     preferred_element_type=jnp.float32)          # (tq, Dh)
        # Normalize after the PV matmul (Sq*Dh muls, EUP reciprocal) and write
        # this head's result into the scratch slab immediately -> bounded live
        # range, no end-of-kernel concatenate/relayout.
        o_acc[:, lo:hi] = pv * pl.reciprocal(denom, approx=True)
    # single cast + lane-dense (tq, E) store
    o_ref[...] = o_acc[...].astype(o_ref.dtype)


def attention_pallas(q, kv, num_heads):
    """q: (B, Sq, E), kv: (B, Sk, 2E) with [K | V] fused -> (B, Sq, E)."""
    B, Sq, E = q.shape
    Sk = kv.shape[1]
    assert kv.shape == (B, Sk, 2 * E)
    assert E % num_heads == 0
    head_dim = E // num_heads
    scale = head_dim ** (-0.5)

    isz = jnp.dtype(q.dtype).itemsize
    budget = _vmem_budget_bytes()

    # tq capped at 256: keeps the f32 score/prob working set in the vreg file
    # and gives megacore enough (B * Sq/tq) grid steps to shard.
    tq = _pick_tile(Sq, (256, 128, 64, 32, 16, 8))

    def est(tq_):
        return (2 * tq_ * E * isz            # double-buffered q blocks
                + 2 * Sk * 2 * E * isz       # double-buffered fused K|V block
                + 2 * tq_ * E * isz          # double-buffered output
                + tq_ * E * 4                # f32 output scratch slab
                + 3 * tq_ * Sk * 4           # f32 score/prob temporaries
                + tq_ * head_dim * 4)        # per-head pv temporary

    while est(tq) > budget and tq % 2 == 0 and tq > 8 and Sq % (tq // 2) == 0:
        tq //= 2

    cost = pl.CostEstimate(
        flops=4 * B * Sq * Sk * E,
        transcendentals=B * num_heads * Sq * (Sk + 1),
        bytes_accessed=(2 * B * Sq * E + 2 * B * Sk * E) * isz)

    kernel = functools.partial(_attn_kernel, num_heads=num_heads,
                               head_dim=head_dim, scale=scale)
    return pl.pallas_call(
        kernel,
        out_shape=jax.ShapeDtypeStruct((B, Sq, E), q.dtype),
        grid=(B, Sq // tq),
        in_specs=[
            pl.BlockSpec((None, tq, E), lambda b, i: (b, i, 0)),
            pl.BlockSpec((None, Sk, 2 * E), lambda b, i: (b, 0, 0)),
        ],
        out_specs=pl.BlockSpec((None, tq, E), lambda b, i: (b, i, 0)),
        scratch_shapes=[pltpu.VMEM((tq, E), jnp.float32)],
        compiler_params=_compiler_params(("parallel", "parallel"), est(tq)),
        cost_estimate=cost,
    )(q, kv)


# ----------------------------------------------------------------------------
# CrossAttention forward (matches the PyTorch module's math path).
# ----------------------------------------------------------------------------
def cross_attention_forward(params, latent, context, num_heads):
    """
    latent:  (B, Sq, latent_dim)
    context: (B, Sk, context_dim)
    returns: (B, Sq, latent_dim)
    """
    # Params are stored PyTorch-style (Dout, Din); transpose / fuse once per
    # call at the XLA level (outside the kernels) so every GEMM consumes
    # canonical (K, N) blocks.  For repeated inference, pre-store them fused.
    wq_t = params["wq"].T                                            # (Dlat, E)
    wkv_t = jnp.concatenate([params["wk"], params["wv"]], axis=0).T  # (Dctx, 2E)
    bkv = jnp.concatenate([params["bk"], params["bv"]], axis=0)      # (2E,)
    wo_t = params["wo"].T                                            # (E, Dlat)

    q = linear_pallas(latent, wq_t, params["bq"])     # (B, Sq, E)
    kv = linear_pallas(context, wkv_t, bkv)           # (B, Sk, 2E) fused K|V

    # Heads are split/merged inside the attention kernel; the fused K|V slab is
    # consumed directly (no wrapper split copies, no (B,S,H,Dh) transposes).
    out = attention_pallas(q, kv, num_heads)          # (B, Sq, E)

    out = linear_pallas(out, wo_t, params["bo"])      # (B, Sq, latent_dim)
    # nn.Dropout(p=0.0) in out_proj is identity in this forward; nothing to do.
    return out


# ----------------------------------------------------------------------------
# Deterministic parameter init (xavier_uniform weights, zero biases),
# mirroring CrossAttention.init_weights().
# ----------------------------------------------------------------------------
def xavier_uniform(key, out_features, in_features, dtype=jnp.float32):
    limit = (6.0 / (in_features + out_features)) ** 0.5
    return jax.random.uniform(key, (out_features, in_features), dtype,
                              minval=-limit, maxval=limit)


def init_params(key, context_dim, latent_dim, embed_dim, dtype=jnp.float32):
    kq, kk, kv, ko = jax.random.split(key, 4)
    return {
        "wq": xavier_uniform(kq, embed_dim, latent_dim, dtype),
        "bq": jnp.zeros((embed_dim,), dtype),
        "wk": xavier_uniform(kk, embed_dim, context_dim, dtype),
        "bk": jnp.zeros((embed_dim,), dtype),
        "wv": xavier_uniform(kv, embed_dim, context_dim, dtype),
        "bv": jnp.zeros((embed_dim,), dtype),
        "wo": xavier_uniform(ko, latent_dim, embed_dim, dtype),
        "bo": jnp.zeros((latent_dim,), dtype),
    }


# ----------------------------------------------------------------------------
# Pure-JAX reference (same math) used only for correctness checking.
# ----------------------------------------------------------------------------
def cross_attention_ref(params, latent, context, num_heads):
    B, Sq, _ = latent.shape
    Sk = context.shape[1]
    E = params["wq"].shape[0]
    Dh = E // num_heads
    scale = Dh ** (-0.5)

    q = latent @ params["wq"].T + params["bq"]
    k = context @ params["wk"].T + params["bk"]
    v = context @ params["wv"].T + params["bv"]
    q = q.reshape(B, Sq, num_heads, Dh).transpose(0, 2, 1, 3) * scale
    k = k.reshape(B, Sk, num_heads, Dh).transpose(0, 2, 1, 3)
    v = v.reshape(B, Sk, num_heads, Dh).transpose(0, 2, 1, 3)
    attn = jax.nn.softmax(jnp.einsum("bhqd,bhkd->bhqk", q, k), axis=-1)
    out = jnp.einsum("bhqk,bhkd->bhqd", attn, v)
    out = out.transpose(0, 2, 1, 3).reshape(B, Sq, E)
    return out @ params["wo"].T + params["bo"]


if __name__ == "__main__":
    # Small shapes consistent with the module's forward.
    batch = 2
    latent_seq_len = 16
    context_seq_len = 8
    latent_dim = 32
    context_dim = 24
    embed_dim = 32
    num_heads = 4          # head_dim = 8

    key = jax.random.PRNGKey(0)
    kp, kl, kc = jax.random.split(key, 3)

    params = init_params(kp, context_dim, latent_dim, embed_dim)
    latent = jax.random.normal(kl, (batch, latent_seq_len, latent_dim), jnp.float32)
    context = jax.random.normal(kc, (batch, context_seq_len, context_dim), jnp.float32)

    out = cross_attention_forward(params, latent, context, num_heads)
    out = jax.block_until_ready(out)

    ref = cross_attention_ref(params, latent, context, num_heads)
    assert out.shape == (batch, latent_seq_len, latent_dim)
    # approx reciprocal (EUP) in the softmax normalization -> slightly looser tol.
    assert jnp.allclose(out, ref, atol=5e-3, rtol=5e-3), "Pallas output mismatch vs reference"

    print("KERNEL_OK")
</pallas_src>

<mosaic_0001>
module attributes {stable_mosaic.version = 11 : i64} {
  func.func @_linear_kernel(%arg0: i32, %arg1: i32, %arg2: i32, %arg3: memref<32x32xf32, #tpu.memory_space<vmem>>, %arg4: memref<32x32xf32, #tpu.memory_space<vmem>>, %arg5: memref<1x32xf32, #tpu.memory_space<vmem>>, %arg6: memref<32x32xf32, #tpu.memory_space<vmem>>, %arg7: memref<32x32xf32, #tpu.memory_space<vmem>>) attributes {dimension_semantics = [#tpu.dimension_semantics<parallel>, #tpu.dimension_semantics<parallel>, #tpu.dimension_semantics<arbitrary>], iteration_bounds = array<i64: 1, 1, 1>, scalar_prefetch = 0 : i64, scratch_operands = 1 : i64, tpu.core_type = #tpu.core_type<tc>, window_params = [{transform_indices = @transform_0, window_bounds = array<i64: 32, 32>}, {transform_indices = @transform_1, window_bounds = array<i64: 32, 32>}, {transform_indices = @transform_2, window_bounds = array<i64: 1, 32>}, {transform_indices = @transform_3, window_bounds = array<i64: 32, 32>}]} {
    %c0_i32 = arith.constant 0 : i32
    %0 = arith.cmpi eq, %arg2, %c0_i32 : i32
    %1 = arith.extui %0 : i1 to i32
    %c0_i32_0 = arith.constant 0 : i32
    %2 = arith.cmpi ne, %1, %c0_i32_0 : i32
    scf.if %2 {
      %cst_10 = arith.constant 0.000000e+00 : f32
      %12 = vector.broadcast %cst_10 : f32 to vector<32x32xf32>
      %c0_11 = arith.constant 0 : index
      %c0_12 = arith.constant 0 : index
      %13 = vector.load %arg7[%c0_11, %c0_12] : memref<32x32xf32, #tpu.memory_space<vmem>>, vector<32x32xf32>
      tpu.vector_store %arg7[%c0_11, %c0_12], %12 {strides = array<i32>} : memref<32x32xf32, #tpu.memory_space<vmem>>, vector<32x32xf32>,
    } else {
    }
    %c0 = arith.constant 0 : index
    %c0_1 = arith.constant 0 : index
    %3 = vector.load %arg7[%c0, %c0_1] : memref<32x32xf32, #tpu.memory_space<vmem>>, vector<32x32xf32>
    %c0_2 = arith.constant 0 : index
    %c0_3 = arith.constant 0 : index
    %4 = vector.load %arg3[%c0_2, %c0_3] : memref<32x32xf32, #tpu.memory_space<vmem>>, vector<32x32xf32>
    %c0_4 = arith.constant 0 : index
    %c0_5 = arith.constant 0 : index
    %5 = vector.load %arg4[%c0_4, %c0_5] : memref<32x32xf32, #tpu.memory_space<vmem>>, vector<32x32xf32>
    %cst = arith.constant dense<0.000000e+00> : vector<32x32xf32>
    %6 = tpu.matmul %4, %5, %cst {dimension_numbers = #tpu.dot_dimension_numbers<[1], [0], [0], [1], [0, 0, 1, 1], [], []>} : vector<32x32xf32>, vector<32x32xf32>, vector<32x32xf32> -> vector<32x32xf32>
    %7 = arith.addf %3, %6 : vector<32x32xf32>
    %c0_6 = arith.constant 0 : index
    %c0_7 = arith.constant 0 : index
    %8 = vector.load %arg7[%c0_6, %c0_7] : memref<32x32xf32, #tpu.memory_space<vmem>>, vector<32x32xf32>
    tpu.vector_store %arg7[%c0_6, %c0_7], %7 {strides = array<i32>} : memref<32x32xf32, #tpu.memory_space<vmem>>, vector<32x32xf32>,
    %c0_i32_8 = arith.constant 0 : i32
    %9 = arith.cmpi eq, %arg2, %c0_i32_8 : i32
    %10 = arith.extui %9 : i1 to i32
    %c0_i32_9 = arith.constant 0 : i32
    %11 = arith.cmpi ne, %10, %c0_i32_9 : i32
    scf.if %11 {
      %c0_10 = arith.constant 0 : index
      %c0_11 = arith.constant 0 : index
      %12 = vector.load %arg7[%c0_10, %c0_11] : memref<32x32xf32, #tpu.memory_space<vmem>>, vector<32x32xf32>
      %c0_12 = arith.constant 0 : index
      %c0_13 = arith.constant 0 : index
      %13 = vector.load %arg5[%c0_12, %c0_13] : memref<1x32xf32, #tpu.memory_space<vmem>>, vector<1x32xf32>
      %14 = vector.broadcast %13 : vector<1x32xf32> to vector<32x32xf32>
      %15 = arith.addf %12, %14 : vector<32x32xf32>
      %c0_14 = arith.constant 0 : index
      %c0_15 = arith.constant 0 : index
      %16 = vector.load %arg6[%c0_14, %c0_15] : memref<32x32xf32, #tpu.memory_space<vmem>>, vector<32x32xf32>
      tpu.vector_store %arg6[%c0_14, %c0_15], %15 {strides = array<i32>} : memref<32x32xf32, #tpu.memory_space<vmem>>, vector<32x32xf32>,
    } else {
    }
    return
  }
  func.func @transform_0(%arg0: i32, %arg1: i32, %arg2: i32) -> (i32, i32) {
    %c0_i32 = arith.constant 0 : i32
    return %arg0, %arg2 : i32, i32
  }
  func.func @transform_1(%arg0: i32, %arg1: i32, %arg2: i32) -> (i32, i32) {
    %c0_i32 = arith.constant 0 : i32
    return %arg2, %arg1 : i32, i32
  }
  func.func @transform_2(%arg0: i32, %arg1: i32, %arg2: i32) -> (i32, i32) {
    %c0_i32 = arith.constant 0 : i32
    %c0_i32_0 = arith.constant 0 : i32
    return %c0_i32, %arg1 : i32, i32
  }
  func.func @transform_3(%arg0: i32, %arg1: i32, %arg2: i32) -> (i32, i32) {
    %c0_i32 = arith.constant 0 : i32
    return %arg0, %arg1 : i32, i32
  }
}

</mosaic_0001>

<bundles_post_ra>
// kernel: tpu_custom_call.1
= control target key start
LH: loop header
LB: loop body
LE: loop exit
PB: predicated region body
PF: predicated region fallthrough
CT: control target
= control target key end

     0   :  { %8 = vsyncpa [#allocation4], 0  ;;  %s417_s0 = inlined_call_operand.hbm [shape: f32[32,32], index: 0, kind: input, shape index: {}]   ;;  %s418_s1 = inlined_call_operand.hbm [shape: f32[32,32], index: 1, kind: input, shape index: {}]   ;;  %s419_s2 = inlined_call_operand.vmem [shape: f32[1,32], index: 2, kind: input, shape index: {}]   ;;  %s420_s3 = inlined_call_operand.hbm [shape: f32[32,32], index: 3, kind: output, shape index: {}]  }
   0x1   :  { %9 = vsyncpa [#allocation7], 0 }
   0x2   :  { %10 = vsyncpa [#allocation5], 0  ;;  %s327_s12 = smov [#allocation3]   ;;  %s255_s16 = scalar_lea.hbm %s417_s0, 512 }
   0x3   :  { %s16_s13 = sshll.u32 %s327_s12, 4  ;;  %p256_p0 = scmp.ne.s32.totalorder %s417_s0, %s255_s16  ;;  %s17_s13 = int_to_ptr.vmem [resolvable:$true] %s16_s13 }
   0x4   :  { %p259_p1 = scmp.lt.u32.totalorder %s255_s16, %s417_s0 }
   0x6   :  { %p261_p2 = pnand %p259_p1, %p256_p0 }
   0x8   :  { %264 = shalt.err (!%p261_p2)
}
   0x9   :  { %s265_s21 = scalar_lea.vmem %s17_s13, 512  ;;  %p270_p4 = scmp.lt.s32.totalorder %s17_s13, %s17_s13 }
   0xa   :  { %p266_p3 = scmp.ne.s32.totalorder %s17_s13, %s265_s21  ;;  %p271_p5 = scmp.lt.s32.totalorder %s265_s21, %s265_s21 }
   0xc   :  { %p272_p6 = por %p271_p5, %p270_p4 }
   0xe   :  { %p273_p7 = pnand %p272_p6, %p266_p3 }
  0x10   :  { %276 = shalt.err (!%p273_p7)
}
  0x11   :  { %s328_s22 = smov 128   ;;  %s329_s23 = smov 8  }
  0x12   :  { %22 = dma.hbm_to_vmem [thread:$0]  %s417_s0, 512, %s17_s13, [#allocation4], %s328_s22, %s328_s22, %s329_s23  }
  0x13   :  { %s330_s26 = smov [#allocation6]   ;;  %s277_s30 = scalar_lea.hbm %s418_s1, 512 }
  0x14   :  { %s28_s27 = sshll.u32 %s330_s26, 4  ;;  %p278_p8 = scmp.ne.s32.totalorder %s418_s1, %s277_s30  ;;  %s29_s27 = int_to_ptr.vmem [resolvable:$true] %s28_s27 }
  0x15   :  { %p281_p9 = scmp.lt.u32.totalorder %s277_s30, %s418_s1 }
  0x17   :  { %p283_p10 = pnand %p281_p9, %p278_p8 }
  0x19   :  { %286 = shalt.err (!%p283_p10)
}
  0x1a   :  { %s287_s8 = scalar_lea.vmem %s29_s27, 512  ;;  %p292_p12 = scmp.lt.s32.totalorder %s29_s27, %s29_s27 }
  0x1b   :  { %p288_p11 = scmp.ne.s32.totalorder %s29_s27, %s287_s8  ;;  %p293_p13 = scmp.lt.s32.totalorder %s287_s8, %s287_s8 }
  0x1d   :  { %p294_p0 = por %p293_p13, %p292_p12 }
  0x1f   :  { %p295_p1 = pnand %p294_p0, %p288_p11 }
  0x21   :  { %298 = shalt.err (!%p295_p1)
}
  0x22   :  { %34 = dma.hbm_to_vmem [thread:$0]  %s418_s1, 512, %s29_s27, [#allocation7], %s328_s22, %s328_s22, %s329_s23  }
  0x23   :  { %321 = dma.done.wait [#allocation4], 512  }
  0x24   :  { %322 = vsyncadd [#allocation4], 4294966784 }
  0x25   :  { %323 = dma.done.wait [#allocation7], 512  }
  0x26   :  { %324 = vsyncadd [#allocation7], 4294966784  ;;  %vm47_vm0 = vcmask 261120   ;;  %v331_v0 = vmov 0.0   ;;  %v60_v1 = vld [vmem:[#allocation6] sm:$0xff]  ;;  %v61_v2 = vld [vmem:[#allocation6 + $0x8] sm:$0xff] }
  0x27   :  { %49 = vst.msk [vmem:[#allocation2 + $0x8] sm:$0xff] %vm47_vm0, %v331_v0  ;;  %48 = vst.msk [vmem:[#allocation2] sm:$0xff] %vm47_vm0, %v331_v0  ;;  %v62_v3 = vld [vmem:[#allocation6 + $0x10] sm:$0xff]  ;;  %v237_v4 = vpack.c.bf16 %v61_v2, %v60_v1  ;;  %v63_v5 = vld [vmem:[#allocation6 + $0x18] sm:$0xff]  ;;  %s332_s11 = smov [#allocation8]  }
  0x28   :  { %50 = vst.msk [vmem:[#allocation2 + $0x10] sm:$0xff] %vm47_vm0, %v331_v0  ;;  %51 = vst.msk [vmem:[#allocation2 + $0x18] sm:$0xff] %vm47_vm0, %v331_v0  ;;  %v56_v6 = vld [vmem:[#allocation3] sm:$0xff]  ;;  %v58_v7 = vld [vmem:[#allocation3 + $0x10] sm:$0xff]  ;;  %v241_v8 = vpack.c.bf16 %v63_v5, %v62_v3  ;;  %s197_s12 = sshll.u32 %s332_s11, 4  ;;  %s198_s12 = int_to_ptr.vmem [resolvable:$true] %s197_s12 }
  0x29   :  { %231 = vmatprep.mubr.msk.f32.mxu0 %vm47_vm0, %v56_v6  ;;  %234 = vmatprep.mubr.msk.f32.mxu1 %vm47_vm0, %v58_v7  ;;  %v57_v9 = vld [vmem:[#allocation3 + $0x8] sm:$0xff]  ;;  %v59_v10 = vld [vmem:[#allocation3 + $0x18] sm:$0xff]  ;;  %v214_v23 = vld [vmem:[%s419_s2] ss:$0 sm:$0xff]  ;;  %s299_s2 = scalar_lea.vmem %s198_s12, 512  ;;  %p304_p3 = scmp.lt.s32.totalorder %s198_s12, %s198_s12 }
  0x2a   :  { %238 = vmatprep.subr.bf16.mxu0 %v237_v4  ;;  %245 = vmatprep.subr.bf16.mxu1 %v237_v4  ;;  %p300_p2 = scmp.ne.s32.totalorder %s198_s12, %s299_s2  ;;  %p305_p4 = scmp.lt.s32.totalorder %s299_s2, %s299_s2 }
  0x2b   :  { %240 = vmatpush3.bf16.msra.mxu0 %v237_v4  ;;  %247 = vmatpush3.bf16.msra.mxu1 %v237_v4 }
  0x2c   :  { %242 = vmatprep.subr.bf16.mxu0 %v241_v8  ;;  %246 = vmatprep.subr.bf16.mxu1 %v241_v8  ;;  %p306_p5 = por %p305_p4, %p304_p3 }
  0x2e   :  { %v53_v11 = vld [vmem:[#allocation2 + $0x8] sm:$0xff]  ;;  %v52_v13 = vld [vmem:[#allocation2] sm:$0xff]  ;;  %p307_p6 = pnand %p306_p5, %p300_p2 }
  0x2f   :  { %244 = vmatpush3.bf16.msra.mxu0 %v241_v8  ;;  %248 = vmatpush3.bf16.msra.mxu1 %v241_v8  ;;  %v55_v12 = vld [vmem:[#allocation2 + $0x18] sm:$0xff]  ;;  %v54_v14 = vld [vmem:[#allocation2 + $0x10] sm:$0xff] }
  0x32   :  { %232 = vmatmul.mubr.msk.f32.vlgmr.msra.gmra.mrb[0].mxu0 %vm47_vm0, %v57_v9  ;;  %235 = vmatmul.mubr.msk.f32.vlgmr.msra.gmra.mrb[0].mxu1 %vm47_vm0, %v59_v10 }
 0x105   :  { %v233_v15 = vpop.f32.mrb[0].mxu0  ;;  %v236_v16 = vpop.f32.mrb[0].mxu1 }
 0x106   :  { %v163_v17 = vadd.f32 %v233_v15, %v53_v11  ;;  %v165_v18 = vadd.f32 %v236_v16, %v55_v12  ;;  %v143_v19 = vpop.f32.mrb[1].mxu0  ;;  %v153_v20 = vpop.f32.mrb[1].mxu1 }
 0x107   :  { %v162_v21 = vadd.f32 %v143_v19, %v52_v13  ;;  %v164_v22 = vadd.f32 %v153_v20, %v54_v14 }
 0x108   :  { %167 = vst.msk [vmem:[#allocation2 + $0x8] sm:$0xff] %vm47_vm0, %v163_v17  ;;  %169 = vst.msk [vmem:[#allocation2 + $0x18] sm:$0xff] %vm47_vm0, %v165_v18 }
 0x109   :  { %166 = vst.msk [vmem:[#allocation2] sm:$0xff] %vm47_vm0, %v162_v21  ;;  %168 = vst.msk [vmem:[#allocation2 + $0x10] sm:$0xff] %vm47_vm0, %v164_v22 }
 0x10f   :  { %v174_v24 = vld [vmem:[#allocation2 + $0x8] sm:$0xff]  ;;  %v176_v25 = vld [vmem:[#allocation2 + $0x18] sm:$0xff] }
 0x110   :  { %v173_v26 = vld [vmem:[#allocation2] sm:$0xff]  ;;  %v175_v27 = vld [vmem:[#allocation2 + $0x10] sm:$0xff]  ;;  %v185_v28 = vadd.f32 %v214_v23, %v174_v24  ;;  %v187_v29 = vadd.f32 %v214_v23, %v176_v25 }
 0x111   :  { %v184_v30 = vadd.f32 %v214_v23, %v173_v26  ;;  %v186_v31 = vadd.f32 %v214_v23, %v175_v27 }
 0x112   :  { %189 = vst.msk [vmem:[#allocation8 + $0x8] sm:$0xff] %vm47_vm0, %v185_v28  ;;  %191 = vst.msk [vmem:[#allocation8 + $0x18] sm:$0xff] %vm47_vm0, %v187_v29 }
 0x113   :  { %188 = vst.msk [vmem:[#allocation8] sm:$0xff] %vm47_vm0, %v184_v30  ;;  %190 = vst.msk [vmem:[#allocation8 + $0x10] sm:$0xff] %vm47_vm0, %v186_v31 }
 0x114   :  { %310 = shalt.err (!%p307_p6)
}
 0x115   :  { %s311_s15 = scalar_lea.hbm %s420_s3, 512 }
 0x116   :  { %p312_p7 = scmp.ne.s32.totalorder %s420_s3, %s311_s15  ;;  %p315_p8 = scmp.lt.u32.totalorder %s311_s15, %s420_s3 }
 0x118   :  { %p317_p9 = pnand %p315_p8, %p312_p7 }
 0x11a   :  { %320 = shalt.err (!%p317_p9)
}
 0x11b   :  { %203 = dma.vmem_to_hbm [thread:$0]  %s198_s12, 512, %s420_s3, [#allocation5], %s328_s22, %s328_s22, %s329_s23  }
 0x11c   :  { %325 = dma.done.wait [#allocation5], 512  }
 0x11d   :  { %326 = vsyncadd [#allocation5], 4294966784 }
 0x11e   :  { %207 = vsyncpa [#allocation4], 1 }
 0x11f   :  { %208 = vsyncpa [#allocation7], 1 }
 0x120   :  { %209 = vsyncpa [#allocation5], 1 }

</bundles_post_ra>
